<compile_context>
chip_gen: v6e
topology: v6e:2x2x1
jax: 0.10.0
libtpu: 0.0.40
codegen_flags: <defaults>
</compile_context>

<pallas_src>
import math
from functools import partial

import jax
import jax.numpy as jnp
from jax.experimental import pallas as pl
from jax.experimental.pallas import tpu as pltpu


def _layernorm(v, gamma, beta, eps):
    # biased variance (matches torch var(unbiased=False)); rsqrt -> EUP slot
    mean = jnp.mean(v, axis=-1, keepdims=True)
    c = v - mean
    var = jnp.mean(c * c, axis=-1, keepdims=True)
    return gamma * (c * jax.lax.rsqrt(var + eps)) + beta


def _gelu_exact(x):
    # matches nn.GELU() default (erf-based, not tanh approximation)
    return 0.5 * x * (1.0 + jax.lax.erf(x * (1.0 / math.sqrt(2.0))))


def transformer_block_kernel(
    xfull_ref, xtile_ref,            # (1, T, E) full seq  /  (1, TQ, E) q rows
    g1_ref, s1_ref,                  # LayerNorm 1 scale / shift
    wqkv_ref, bqkv_ref,              # fused QKV projection (E, 3E), (1, 3E)
    wo_ref, bo_ref,                  # attention output projection
    g2_ref, s2_ref,                  # LayerNorm 2 scale / shift
    w1_ref, bf1_ref,                 # FF layer 1 (E -> 4E)
    w2_ref, bf2_ref,                 # FF layer 2 (4E -> E)
    o_ref,                           # (1, TQ, E)
    ctx_ref,                         # VMEM scratch (TQ, E) f32 -- head contexts
    *, num_heads, eps, q_tile, ff_chunk, use_bf16,
):
    T, E = xfull_ref.shape[1], xfull_ref.shape[2]
    TQ = q_tile
    hd = E // num_heads
    scale = 1.0 / math.sqrt(hd)
    dd = jnp.bfloat16 if use_bf16 else jnp.float32   # MXU operand dtype

    q_row0 = pl.program_id(1) * TQ                    # absolute first row of tile

    x_full = xfull_ref[0].astype(jnp.float32)         # (T, E)
    x_tile = xtile_ref[0].astype(jnp.float32)         # (TQ, E)

    g1 = g1_ref[...]
    s1 = s1_ref[...]

    # ---- sub-block 1: LN1 -> QKV -> causal MHA -> out proj -> residual ------
    # K/V need the whole sequence; Q only the rows of this tile.
    h_full = _layernorm(x_full, g1, s1, eps).astype(dd)
    h_tile = _layernorm(x_tile, g1, s1, eps).astype(dd)

    kv = jnp.dot(h_full, wqkv_ref[:, E:3 * E],
                 preferred_element_type=jnp.float32) + bqkv_ref[:, E:3 * E]
    q = (jnp.dot(h_tile, wqkv_ref[:, 0:E],
                 preferred_element_type=jnp.float32) + bqkv_ref[:, 0:E]) * scale
    k = kv[:, 0:E].astype(dd)                          # (T, E)
    v = kv[:, E:2 * E].astype(dd)                      # (T, E)

    # causal additive bias for this q tile only: (TQ, T), never (B, T, T)
    rows = q_row0 + jax.lax.broadcasted_iota(jnp.int32, (TQ, T), 0)
    cols = jax.lax.broadcasted_iota(jnp.int32, (TQ, T), 1)
    bias = jnp.where(cols <= rows, 0.0, -1e30).astype(jnp.float32)

    # Per-head scores / softmax / PV.  Each head's context lands in its column
    # slice of ctx_ref so the output projection below is a single K=E matmul.
    # (Static loop kept: at tiny hd the relayouts needed for a batched
    #  'hqd,hkd->hqk' contraction cost more than the extra MXU pushes.)
    for h_idx in range(num_heads):
        lo = h_idx * hd
        q_h = q[:, lo:lo + hd].astype(dd)              # (TQ, hd)
        k_h = k[:, lo:lo + hd]                         # (T,  hd)
        v_h = v[:, lo:lo + hd]                         # (T,  hd)
        s = jnp.dot(q_h, k_h.T, preferred_element_type=jnp.float32) + bias
        s = s - jnp.max(s, axis=-1, keepdims=True)
        p = jnp.exp(s)
        p = p / jnp.sum(p, axis=-1, keepdims=True)     # exact normalization, f32
        ctx_ref[:, lo:lo + hd] = jnp.dot(p.astype(dd), v_h,
                                         preferred_element_type=jnp.float32)

    att = jnp.dot(ctx_ref[...].astype(dd), wo_ref[...],
                  preferred_element_type=jnp.float32) + bo_ref[...]

    x1 = x_tile + att                                  # drop_shortcut = identity

    # ---- sub-block 2: LN2 -> FeedForward (chunked hidden dim) -> residual ---
    h2 = _layernorm(x1, g2_ref[...], s2_ref[...], eps).astype(dd)
    hidden = w1_ref.shape[1]
    acc = jnp.zeros((TQ, E), jnp.float32)
    for c0 in range(0, hidden, ff_chunk):
        f = jnp.dot(h2, w1_ref[:, c0:c0 + ff_chunk],
                    preferred_element_type=jnp.float32) + bf1_ref[:, c0:c0 + ff_chunk]
        f = _gelu_exact(f)
        acc = acc + jnp.dot(f.astype(dd), w2_ref[c0:c0 + ff_chunk, :],
                            preferred_element_type=jnp.float32)

    o_ref[0] = (x1 + acc + bf2_ref[...]).astype(o_ref.dtype)


def transformer_block(x, params, *, num_heads, eps=1e-5, use_bf16_matmul=True):
    B, T, E = x.shape
    hidden = params["w_ff1"].shape[1]
    assert E % num_heads == 0

    # q-row tile: whole sequence for small T, else 128-row tiles
    # TODO(synk): use 256-row tiles on v6e/v7x (2x256 MXU) once T is large.
    TQ = T if T <= 128 else 128
    assert T % TQ == 0
    num_q_tiles = T // TQ

    FC = hidden if hidden <= 512 else 512              # FF hidden chunk (lanes)
    assert hidden % FC == 0

    dot_dtype = jnp.bfloat16 if use_bf16_matmul else jnp.float32

    # fuse QKV weights once in the wrapper; store weights in the MXU dtype
    w_qkv = jnp.concatenate(
        [params["w_q"], params["w_k"], params["w_v"]], axis=1).astype(dot_dtype)
    b_qkv = jnp.concatenate(
        [params["b_q"], params["b_k"], params["b_v"]], axis=1).astype(jnp.float32)
    w_o = params["w_o"].astype(dot_dtype)
    w_ff1 = params["w_ff1"].astype(dot_dtype)
    w_ff2 = params["w_ff2"].astype(dot_dtype)

    kernel = partial(transformer_block_kernel, num_heads=num_heads, eps=eps,
                     q_tile=TQ, ff_chunk=FC, use_bf16=use_bf16_matmul)

    def full(shape):
        # whole-array block with a constant index map: fetched once, stays
        # resident across grid steps (weights never change per step).
        return pl.BlockSpec(shape, lambda *_: (0,) * len(shape))

    in_specs = [
        pl.BlockSpec((1, T, E), lambda b, qi: (b, 0, 0)),    # x, full seq (K/V)
        pl.BlockSpec((1, TQ, E), lambda b, qi: (b, qi, 0)),  # x, q rows / residual
        full(params["ln1_scale"].shape), full(params["ln1_shift"].shape),
        full(w_qkv.shape), full(b_qkv.shape),
        full(w_o.shape), full(params["b_o"].shape),
        full(params["ln2_scale"].shape), full(params["ln2_shift"].shape),
        full(w_ff1.shape), full(params["b_ff1"].shape),
        full(w_ff2.shape), full(params["b_ff2"].shape),
    ]

    # VMEM budget per generation: ~3/4 of per-core VMEM, capped at 96 MiB
    # (v5e/v6e: 96 MiB of 128; v7x: 48 MiB of 64), floor at the 32 MiB default.
    try:
        vmem_cap = int(pltpu.get_tpu_info().vmem_capacity_bytes)
    except Exception:
        vmem_cap = 64 * 1024 * 1024
    vmem_limit = max(32 * 1024 * 1024, min(3 * vmem_cap // 4, 96 * 1024 * 1024))

    fn = pl.pallas_call(
        kernel,
        out_shape=jax.ShapeDtypeStruct((B, T, E), x.dtype),
        grid_spec=pltpu.PrefetchScalarGridSpec(
            num_scalar_prefetch=0,
            grid=(B, num_q_tiles),
            in_specs=in_specs,
            out_specs=pl.BlockSpec((1, TQ, E), lambda b, qi: (b, qi, 0)),
            scratch_shapes=[pltpu.VMEM((TQ, E), jnp.float32)],
        ),
        compiler_params=pltpu.CompilerParams(
            dimension_semantics=("parallel", "parallel"),
            vmem_limit_bytes=vmem_limit,
        ),
    )
    return fn(
        x, x,
        params["ln1_scale"], params["ln1_shift"],
        w_qkv, b_qkv,
        w_o, params["b_o"],
        params["ln2_scale"], params["ln2_shift"],
        w_ff1, params["b_ff1"],
        w_ff2, params["b_ff2"],
    )


def reference_block(x, params, *, num_heads, eps=1e-5):
    """Pure-JAX reference mirroring the PyTorch forward (eval mode, f32)."""
    B, T, E = x.shape
    hd = E // num_heads

    def ln(v, g, b):
        mean = jnp.mean(v, axis=-1, keepdims=True)
        var = jnp.mean((v - mean) ** 2, axis=-1, keepdims=True)
        return g * ((v - mean) / jnp.sqrt(var + eps)) + b

    h = ln(x, params["ln1_scale"], params["ln1_shift"])
    q = h @ params["w_q"] + params["b_q"]
    k = h @ params["w_k"] + params["b_k"]
    v = h @ params["w_v"] + params["b_v"]
    q = q.reshape(B, T, num_heads, hd).transpose(0, 2, 1, 3)
    k = k.reshape(B, T, num_heads, hd).transpose(0, 2, 1, 3)
    v = v.reshape(B, T, num_heads, hd).transpose(0, 2, 1, 3)
    scores = jnp.einsum("bhqd,bhkd->bhqk", q, k) / math.sqrt(hd)
    mask = jnp.tril(jnp.ones((T, T), dtype=bool))
    scores = jnp.where(mask, scores, -jnp.inf)
    probs = jax.nn.softmax(scores, axis=-1)
    ctx = jnp.einsum("bhqk,bhkd->bhqd", probs, v).transpose(0, 2, 1, 3).reshape(B, T, E)
    att = ctx @ params["w_o"] + params["b_o"]
    x = x + att

    h2 = ln(x, params["ln2_scale"], params["ln2_shift"])
    f = h2 @ params["w_ff1"] + params["b_ff1"]
    f = _gelu_exact(f)
    f = f @ params["w_ff2"] + params["b_ff2"]
    return x + f


if __name__ == "__main__":
    # cfg: embeding_dem=32, context_length=8, n_heads=4, dropout_rate=0.0, qkv_bias=True
    B, T, E, H = 2, 8, 32, 4
    HIDDEN = 4 * E

    key = jax.random.PRNGKey(0)
    keys = jax.random.split(key, 16)

    def winit(k, shape, scale=0.02):
        return (scale * jax.random.normal(k, shape)).astype(jnp.float32)

    params = {
        "ln1_scale": jnp.ones((1, E), jnp.float32),
        "ln1_shift": jnp.zeros((1, E), jnp.float32),
        "w_q": winit(keys[0], (E, E)), "b_q": winit(keys[1], (1, E)),
        "w_k": winit(keys[2], (E, E)), "b_k": winit(keys[3], (1, E)),
        "w_v": winit(keys[4], (E, E)), "b_v": winit(keys[5], (1, E)),
        "w_o": winit(keys[6], (E, E)), "b_o": winit(keys[7], (1, E)),
        "ln2_scale": jnp.ones((1, E), jnp.float32),
        "ln2_shift": jnp.zeros((1, E), jnp.float32),
        "w_ff1": winit(keys[8], (E, HIDDEN)), "b_ff1": winit(keys[9], (1, HIDDEN)),
        "w_ff2": winit(keys[10], (HIDDEN, E)), "b_ff2": winit(keys[11], (1, E)),
    }

    x = jax.random.normal(keys[12], (B, T, E), dtype=jnp.float32)

    ref = reference_block(x, params, num_heads=H)

    # primary (performance) path: bf16 MXU operands, f32 accumulation
    out_bf16 = jax.block_until_ready(
        transformer_block(x, params, num_heads=H, use_bf16_matmul=True))
    assert out_bf16.shape == (B, T, E)
    assert jnp.allclose(out_bf16, ref, atol=2e-2, rtol=2e-2), \
        "bf16-matmul kernel mismatch vs JAX reference"

    # strict-precision path: f32 operands, tight tolerance
    out_f32 = jax.block_until_ready(
        transformer_block(x, params, num_heads=H, use_bf16_matmul=False))
    assert jnp.allclose(out_f32, ref, atol=2e-5, rtol=2e-5), \
        "f32 kernel mismatch vs JAX reference"

    print("KERNEL_OK")
</pallas_src>

<mosaic_0001>
module attributes {stable_mosaic.version = 11 : i64} {
  func.func @transformer_block_kernel(%arg0: i32, %arg1: i32, %arg2: memref<1x8x32xf32, #tpu.memory_space<vmem>>, %arg3: memref<1x8x32xf32, #tpu.memory_space<vmem>>, %arg4: memref<1x32xf32, #tpu.memory_space<vmem>>, %arg5: memref<1x32xf32, #tpu.memory_space<vmem>>, %arg6: memref<32x96xbf16, #tpu.memory_space<vmem>>, %arg7: memref<1x96xf32, #tpu.memory_space<vmem>>, %arg8: memref<32x32xbf16, #tpu.memory_space<vmem>>, %arg9: memref<1x32xf32, #tpu.memory_space<vmem>>, %arg10: memref<1x32xf32, #tpu.memory_space<vmem>>, %arg11: memref<1x32xf32, #tpu.memory_space<vmem>>, %arg12: memref<32x128xbf16, #tpu.memory_space<vmem>>, %arg13: memref<1x128xf32, #tpu.memory_space<vmem>>, %arg14: memref<128x32xbf16, #tpu.memory_space<vmem>>, %arg15: memref<1x32xf32, #tpu.memory_space<vmem>>, %arg16: memref<1x8x32xf32, #tpu.memory_space<vmem>>, %arg17: memref<8x32xf32, #tpu.memory_space<vmem>>) attributes {dimension_semantics = [#tpu.dimension_semantics<parallel>, #tpu.dimension_semantics<parallel>], iteration_bounds = array<i64: 2, 1>, scalar_prefetch = 0 : i64, scratch_operands = 1 : i64, tpu.core_type = #tpu.core_type<tc>, window_params = [{transform_indices = @transform_0, window_bounds = array<i64: 1, 8, 32>}, {transform_indices = @transform_1, window_bounds = array<i64: 1, 8, 32>}, {pipeline_mode = #tpu.pipeline_mode<synchronous>, transform_indices = @transform_2, window_bounds = array<i64: 1, 32>}, {pipeline_mode = #tpu.pipeline_mode<synchronous>, transform_indices = @transform_3, window_bounds = array<i64: 1, 32>}, {pipeline_mode = #tpu.pipeline_mode<synchronous>, transform_indices = @transform_4, window_bounds = array<i64: 32, 96>}, {pipeline_mode = #tpu.pipeline_mode<synchronous>, transform_indices = @transform_5, window_bounds = array<i64: 1, 96>}, {pipeline_mode = #tpu.pipeline_mode<synchronous>, transform_indices = @transform_6, window_bounds = array<i64: 32, 32>}, {pipeline_mode = #tpu.pipeline_mode<synchronous>, transform_indices = @transform_7, window_bounds = array<i64: 1, 32>}, {pipeline_mode = #tpu.pipeline_mode<synchronous>, transform_indices = @transform_8, window_bounds = array<i64: 1, 32>}, {pipeline_mode = #tpu.pipeline_mode<synchronous>, transform_indices = @transform_9, window_bounds = array<i64: 1, 32>}, {pipeline_mode = #tpu.pipeline_mode<synchronous>, transform_indices = @transform_10, window_bounds = array<i64: 32, 128>}, {pipeline_mode = #tpu.pipeline_mode<synchronous>, transform_indices = @transform_11, window_bounds = array<i64: 1, 128>}, {pipeline_mode = #tpu.pipeline_mode<synchronous>, transform_indices = @transform_12, window_bounds = array<i64: 128, 32>}, {pipeline_mode = #tpu.pipeline_mode<synchronous>, transform_indices = @transform_13, window_bounds = array<i64: 1, 32>}, {transform_indices = @transform_14, window_bounds = array<i64: 1, 8, 32>}]} {
    %c8_i32 = arith.constant 8 : i32
    %0 = arith.muli %arg1, %c8_i32 : i32
    %c0 = arith.constant 0 : index
    %c0_0 = arith.constant 0 : index
    %c0_1 = arith.constant 0 : index
    %1 = vector.load %arg2[%c0, %c0_0, %c0_1] : memref<1x8x32xf32, #tpu.memory_space<vmem>>, vector<1x8x32xf32>
    %2 = vector.shape_cast %1 : vector<1x8x32xf32> to vector<8x32xf32>
    %c0_2 = arith.constant 0 : index
    %c0_3 = arith.constant 0 : index
    %c0_4 = arith.constant 0 : index
    %3 = vector.load %arg3[%c0_2, %c0_3, %c0_4] : memref<1x8x32xf32, #tpu.memory_space<vmem>>, vector<1x8x32xf32>
    %4 = vector.shape_cast %3 : vector<1x8x32xf32> to vector<8x32xf32>
    %c0_5 = arith.constant 0 : index
    %c0_6 = arith.constant 0 : index
    %5 = vector.load %arg4[%c0_5, %c0_6] : memref<1x32xf32, #tpu.memory_space<vmem>>, vector<1x32xf32>
    %c0_7 = arith.constant 0 : index
    %c0_8 = arith.constant 0 : index
    %6 = vector.load %arg5[%c0_7, %c0_8] : memref<1x32xf32, #tpu.memory_space<vmem>>, vector<1x32xf32>
    %cst = arith.constant dense<0.000000e+00> : vector<8xf32>
    %7 = vector.multi_reduction <add>, %2, %cst [1] : vector<8x32xf32> to vector<8xf32>
    %8 = vector.shape_cast %7 : vector<8xf32> to vector<8x1xf32>
    %cst_9 = arith.constant 3.200000e+01 : f32
    %9 = vector.broadcast %cst_9 : f32 to vector<8x1xf32>
    %10 = arith.divf %8, %9 : vector<8x1xf32>
    %11 = vector.broadcast %10 : vector<8x1xf32> to vector<8x32xf32>
    %12 = arith.subf %2, %11 : vector<8x32xf32>
    %13 = arith.mulf %12, %12 : vector<8x32xf32>
    %cst_10 = arith.constant dense<0.000000e+00> : vector<8xf32>
    %14 = vector.multi_reduction <add>, %13, %cst_10 [1] : vector<8x32xf32> to vector<8xf32>
    %15 = vector.shape_cast %14 : vector<8xf32> to vector<8x1xf32>
    %cst_11 = arith.constant 3.200000e+01 : f32
    %16 = vector.broadcast %cst_11 : f32 to vector<8x1xf32>
    %17 = arith.divf %15, %16 : vector<8x1xf32>
    %cst_12 = arith.constant 9.99999974E-6 : f32
    %18 = vector.broadcast %cst_12 : f32 to vector<8x1xf32>
    %19 = arith.addf %17, %18 : vector<8x1xf32>
    %20 = math.rsqrt %19 : vector<8x1xf32>
    %21 = vector.broadcast %20 : vector<8x1xf32> to vector<8x32xf32>
    %22 = arith.mulf %12, %21 : vector<8x32xf32>
    %23 = vector.broadcast %5 : vector<1x32xf32> to vector<8x32xf32>
    %24 = arith.mulf %23, %22 : vector<8x32xf32>
    %25 = vector.broadcast %6 : vector<1x32xf32> to vector<8x32xf32>
    %26 = arith.addf %24, %25 : vector<8x32xf32>
    %27 = arith.truncf %26 : vector<8x32xf32> to vector<8x32xbf16>
    %cst_13 = arith.constant dense<0.000000e+00> : vector<8xf32>
    %28 = vector.multi_reduction <add>, %4, %cst_13 [1] : vector<8x32xf32> to vector<8xf32>
    %29 = vector.shape_cast %28 : vector<8xf32> to vector<8x1xf32>
    %cst_14 = arith.constant 3.200000e+01 : f32
    %30 = vector.broadcast %cst_14 : f32 to vector<8x1xf32>
    %31 = arith.divf %29, %30 : vector<8x1xf32>
    %32 = vector.broadcast %31 : vector<8x1xf32> to vector<8x32xf32>
    %33 = arith.subf %4, %32 : vector<8x32xf32>
    %34 = arith.mulf %33, %33 : vector<8x32xf32>
    %cst_15 = arith.constant dense<0.000000e+00> : vector<8xf32>
    %35 = vector.multi_reduction <add>, %34, %cst_15 [1] : vector<8x32xf32> to vector<8xf32>
    %36 = vector.shape_cast %35 : vector<8xf32> to vector<8x1xf32>
    %cst_16 = arith.constant 3.200000e+01 : f32
    %37 = vector.broadcast %cst_16 : f32 to vector<8x1xf32>
    %38 = arith.divf %36, %37 : vector<8x1xf32>
    %cst_17 = arith.constant 9.99999974E-6 : f32
    %39 = vector.broadcast %cst_17 : f32 to vector<8x1xf32>
    %40 = arith.addf %38, %39 : vector<8x1xf32>
    %41 = math.rsqrt %40 : vector<8x1xf32>
    %42 = vector.broadcast %41 : vector<8x1xf32> to vector<8x32xf32>
    %43 = arith.mulf %33, %42 : vector<8x32xf32>
    %44 = vector.broadcast %5 : vector<1x32xf32> to vector<8x32xf32>
    %45 = arith.mulf %44, %43 : vector<8x32xf32>
    %46 = vector.broadcast %6 : vector<1x32xf32> to vector<8x32xf32>
    %47 = arith.addf %45, %46 : vector<8x32xf32>
    %48 = arith.truncf %47 : vector<8x32xf32> to vector<8x32xbf16>
    %c0_18 = arith.constant 0 : index
    %c32 = arith.constant 32 : index
    %49 = vector.load %arg6[%c0_18, %c32] : memref<32x96xbf16, #tpu.memory_space<vmem>>, vector<32x64xbf16>
    %cst_19 = arith.constant dense<0.000000e+00> : vector<8x64xf32>
    %50 = tpu.matmul %27, %49, %cst_19 {dimension_numbers = #tpu.dot_dimension_numbers<[1], [0], [0], [1], [0, 0, 1, 1], [], []>} : vector<8x32xbf16>, vector<32x64xbf16>, vector<8x64xf32> -> vector<8x64xf32>
    %c0_20 = arith.constant 0 : index
    %c32_21 = arith.constant 32 : index
    %51 = vector.load %arg7[%c0_20, %c32_21] : memref<1x96xf32, #tpu.memory_space<vmem>>, vector<1x64xf32>
    %52 = vector.broadcast %51 : vector<1x64xf32> to vector<8x64xf32>
    %53 = arith.addf %50, %52 : vector<8x64xf32>
    %c0_22 = arith.constant 0 : index
    %c0_23 = arith.constant 0 : index
    %54 = vector.load %arg6[%c0_22, %c0_23] : memref<32x96xbf16, #tpu.memory_space<vmem>>, vector<32x32xbf16>
    %cst_24 = arith.constant dense<0.000000e+00> : vector<8x32xf32>
    %55 = tpu.matmul %48, %54, %cst_24 {dimension_numbers = #tpu.dot_dimension_numbers<[1], [0], [0], [1], [0, 0, 1, 1], [], []>} : vector<8x32xbf16>, vector<32x32xbf16>, vector<8x32xf32> -> vector<8x32xf32>
    %c0_25 = arith.constant 0 : index
    %c0_26 = arith.constant 0 : index
    %56 = vector.load %arg7[%c0_25, %c0_26] : memref<1x96xf32, #tpu.memory_space<vmem>>, vector<1x32xf32>
    %57 = vector.broadcast %56 : vector<1x32xf32> to vector<8x32xf32>
    %58 = arith.addf %55, %57 : vector<8x32xf32>
    %cst_27 = arith.constant 0.353553385 : f32
    %59 = vector.broadcast %cst_27 : f32 to vector<8x32xf32>
    %60 = arith.mulf %58, %59 : vector<8x32xf32>
    %61 = vector.extract_strided_slice %53 {offsets = [0, 0], sizes = [8, 32], strides = [1, 1]} : vector<8x64xf32> to vector<8x32xf32>
    %62 = arith.truncf %61 : vector<8x32xf32> to vector<8x32xbf16>
    %63 = vector.extract_strided_slice %53 {offsets = [0, 32], sizes = [8, 32], strides = [1, 1]} : vector<8x64xf32> to vector<8x32xf32>
    %64 = arith.truncf %63 : vector<8x32xf32> to vector<8x32xbf16>
    %65 = tpu.iota {dimensions = array<i32: 0>} : vector<8x8xi32>
    %66 = vector.broadcast %0 : i32 to vector<8x8xi32>
    %67 = arith.addi %66, %65 : vector<8x8xi32>
    %68 = tpu.iota {dimensions = array<i32: 1>} : vector<8x8xi32>
    %69 = arith.cmpi sle, %68, %67 : vector<8x8xi32>
    %cst_28 = arith.constant 0.000000e+00 : f32
    %cst_29 = arith.constant -1.000000e+30 : f32
    %70 = vector.broadcast %cst_28 : f32 to vector<8x8xf32>
    %71 = vector.broadcast %cst_29 : f32 to vector<8x8xf32>
    %72 = arith.select %69, %70, %71 : vector<8x8xi1>, vector<8x8xf32>
    %73 = vector.extract_strided_slice %60 {offsets = [0, 0], sizes = [8, 8], strides = [1, 1]} : vector<8x32xf32> to vector<8x8xf32>
    %74 = arith.truncf %73 : vector<8x8xf32> to vector<8x8xbf16>
    %75 = vector.extract_strided_slice %62 {offsets = [0, 0], sizes = [8, 8], strides = [1, 1]} : vector<8x32xbf16> to vector<8x8xbf16>
    %76 = vector.extract_strided_slice %64 {offsets = [0, 0], sizes = [8, 8], strides = [1, 1]} : vector<8x32xbf16> to vector<8x8xbf16>
    %77 = tpu.transpose %75, [1, 0] : vector<8x8xbf16> -> vector<8x8xbf16>
    %cst_30 = arith.constant dense<0.000000e+00> : vector<8x8xf32>
    %78 = tpu.matmul %74, %77, %cst_30 {dimension_numbers = #tpu.dot_dimension_numbers<[1], [0], [0], [1], [0, 0, 1, 1], [], []>} : vector<8x8xbf16>, vector<8x8xbf16>, vector<8x8xf32> -> vector<8x8xf32>
    %79 = arith.addf %78, %72 : vector<8x8xf32>
    %cst_31 = arith.constant dense<0xFF800000> : vector<8xf32>
    %80 = vector.multi_reduction <maximumf>, %79, %cst_31 [1] : vector<8x8xf32> to vector<8xf32>
    %81 = vector.shape_cast %80 : vector<8xf32> to vector<8x1xf32>
    %82 = vector.broadcast %81 : vector<8x1xf32> to vector<8x8xf32>
    %83 = arith.subf %79, %82 : vector<8x8xf32>
    %84 = math.exp %83 : vector<8x8xf32>
    %cst_32 = arith.constant dense<0.000000e+00> : vector<8xf32>
    %85 = vector.multi_reduction <add>, %84, %cst_32 [1] : vector<8x8xf32> to vector<8xf32>
    %86 = vector.shape_cast %85 : vector<8xf32> to vector<8x1xf32>
    %87 = vector.broadcast %86 : vector<8x1xf32> to vector<8x8xf32>
    %88 = arith.divf %84, %87 : vector<8x8xf32>
    %89 = arith.truncf %88 : vector<8x8xf32> to vector<8x8xbf16>
    %cst_33 = arith.constant dense<0.000000e+00> : vector<8x8xf32>
    %90 = tpu.matmul %89, %76, %cst_33 {dimension_numbers = #tpu.dot_dimension_numbers<[1], [0], [0], [1], [0, 0, 1, 1], [], []>} : vector<8x8xbf16>, vector<8x8xbf16>, vector<8x8xf32> -> vector<8x8xf32>
    %c0_34 = arith.constant 0 : index
    %c0_35 = arith.constant 0 : index
    %91 = vector.load %arg17[%c0_34, %c0_35] : memref<8x32xf32, #tpu.memory_space<vmem>>, vector<8x8xf32>
    tpu.vector_store %arg17[%c0_34, %c0_35], %90 {strides = array<i32>} : memref<8x32xf32, #tpu.memory_space<vmem>>, vector<8x8xf32>,
    %92 = vector.extract_strided_slice %60 {offsets = [0, 8], sizes = [8, 8], strides = [1, 1]} : vector<8x32xf32> to vector<8x8xf32>
    %93 = arith.truncf %92 : vector<8x8xf32> to vector<8x8xbf16>
    %94 = vector.extract_strided_slice %62 {offsets = [0, 8], sizes = [8, 8], strides = [1, 1]} : vector<8x32xbf16> to vector<8x8xbf16>
    %95 = vector.extract_strided_slice %64 {offsets = [0, 8], sizes = [8, 8], strides = [1, 1]} : vector<8x32xbf16> to vector<8x8xbf16>
    %96 = tpu.transpose %94, [1, 0] : vector<8x8xbf16> -> vector<8x8xbf16>
    %cst_36 = arith.constant dense<0.000000e+00> : vector<8x8xf32>
    %97 = tpu.matmul %93, %96, %cst_36 {dimension_numbers = #tpu.dot_dimension_numbers<[1], [0], [0], [1], [0, 0, 1, 1], [], []>} : vector<8x8xbf16>, vector<8x8xbf16>, vector<8x8xf32> -> vector<8x8xf32>
    %98 = arith.addf %97, %72 : vector<8x8xf32>
    %cst_37 = arith.constant dense<0xFF800000> : vector<8xf32>
    %99 = vector.multi_reduction <maximumf>, %98, %cst_37 [1] : vector<8x8xf32> to vector<8xf32>
    %100 = vector.shape_cast %99 : vector<8xf32> to vector<8x1xf32>
    %101 = vector.broadcast %100 : vector<8x1xf32> to vector<8x8xf32>
    %102 = arith.subf %98, %101 : vector<8x8xf32>
    %103 = math.exp %102 : vector<8x8xf32>
    %cst_38 = arith.constant dense<0.000000e+00> : vector<8xf32>
    %104 = vector.multi_reduction <add>, %103, %cst_38 [1] : vector<8x8xf32> to vector<8xf32>
    %105 = vector.shape_cast %104 : vector<8xf32> to vector<8x1xf32>
    %106 = vector.broadcast %105 : vector<8x1xf32> to vector<8x8xf32>
    %107 = arith.divf %103, %106 : vector<8x8xf32>
    %108 = arith.truncf %107 : vector<8x8xf32> to vector<8x8xbf16>
    %cst_39 = arith.constant dense<0.000000e+00> : vector<8x8xf32>
    %109 = tpu.matmul %108, %95, %cst_39 {dimension_numbers = #tpu.dot_dimension_numbers<[1], [0], [0], [1], [0, 0, 1, 1], [], []>} : vector<8x8xbf16>, vector<8x8xbf16>, vector<8x8xf32> -> vector<8x8xf32>
    %c0_40 = arith.constant 0 : index
    %c8 = arith.constant 8 : index
    %110 = vector.load %arg17[%c0_40, %c8] : memref<8x32xf32, #tpu.memory_space<vmem>>, vector<8x8xf32>
    tpu.vector_store %arg17[%c0_40, %c8], %109 {strides = array<i32>} : memref<8x32xf32, #tpu.memory_space<vmem>>, vector<8x8xf32>,
    %111 = vector.extract_strided_slice %60 {offsets = [0, 16], sizes = [8, 8], strides = [1, 1]} : vector<8x32xf32> to vector<8x8xf32>
    %112 = arith.truncf %111 : vector<8x8xf32> to vector<8x8xbf16>
    %113 = vector.extract_strided_slice %62 {offsets = [0, 16], sizes = [8, 8], strides = [1, 1]} : vector<8x32xbf16> to vector<8x8xbf16>
    %114 = vector.extract_strided_slice %64 {offsets = [0, 16], sizes = [8, 8], strides = [1, 1]} : vector<8x32xbf16> to vector<8x8xbf16>
    %115 = tpu.transpose %113, [1, 0] : vector<8x8xbf16> -> vector<8x8xbf16>
    %cst_41 = arith.constant dense<0.000000e+00> : vector<8x8xf32>
    %116 = tpu.matmul %112, %115, %cst_41 {dimension_numbers = #tpu.dot_dimension_numbers<[1], [0], [0], [1], [0, 0, 1, 1], [], []>} : vector<8x8xbf16>, vector<8x8xbf16>, vector<8x8xf32> -> vector<8x8xf32>
    %117 = arith.addf %116, %72 : vector<8x8xf32>
    %cst_42 = arith.constant dense<0xFF800000> : vector<8xf32>
    %118 = vector.multi_reduction <maximumf>, %117, %cst_42 [1] : vector<8x8xf32> to vector<8xf32>
    %119 = vector.shape_cast %118 : vector<8xf32> to vector<8x1xf32>
    %120 = vector.broadcast %119 : vector<8x1xf32> to vector<8x8xf32>
    %121 = arith.subf %117, %120 : vector<8x8xf32>
    %122 = math.exp %121 : vector<8x8xf32>
    %cst_43 = arith.constant dense<0.000000e+00> : vector<8xf32>
    %123 = vector.multi_reduction <add>, %122, %cst_43 [1] : vector<8x8xf32> to vector<8xf32>
    %124 = vector.shape_cast %123 : vector<8xf32> to vector<8x1xf32>
    %125 = vector.broadcast %124 : vector<8x1xf32> to vector<8x8xf32>
    %126 = arith.divf %122, %125 : vector<8x8xf32>
    %127 = arith.truncf %126 : vector<8x8xf32> to vector<8x8xbf16>
    %cst_44 = arith.constant dense<0.000000e+00> : vector<8x8xf32>
    %128 = tpu.matmul %127, %114, %cst_44 {dimension_numbers = #tpu.dot_dimension_numbers<[1], [0], [0], [1], [0, 0, 1, 1], [], []>} : vector<8x8xbf16>, vector<8x8xbf16>, vector<8x8xf32> -> vector<8x8xf32>
    %c0_45 = arith.constant 0 : index
    %c16 = arith.constant 16 : index
    %129 = vector.load %arg17[%c0_45, %c16] : memref<8x32xf32, #tpu.memory_space<vmem>>, vector<8x8xf32>
    tpu.vector_store %arg17[%c0_45, %c16], %128 {strides = array<i32>} : memref<8x32xf32, #tpu.memory_space<vmem>>, vector<8x8xf32>,
    %130 = vector.extract_strided_slice %60 {offsets = [0, 24], sizes = [8, 8], strides = [1, 1]} : vector<8x32xf32> to vector<8x8xf32>
    %131 = arith.truncf %130 : vector<8x8xf32> to vector<8x8xbf16>
    %132 = vector.extract_strided_slice %62 {offsets = [0, 24], sizes = [8, 8], strides = [1, 1]} : vector<8x32xbf16> to vector<8x8xbf16>
    %133 = vector.extract_strided_slice %64 {offsets = [0, 24], sizes = [8, 8], strides = [1, 1]} : vector<8x32xbf16> to vector<8x8xbf16>
    %134 = tpu.transpose %132, [1, 0] : vector<8x8xbf16> -> vector<8x8xbf16>
    %cst_46 = arith.constant dense<0.000000e+00> : vector<8x8xf32>
    %135 = tpu.matmul %131, %134, %cst_46 {dimension_numbers = #tpu.dot_dimension_numbers<[1], [0], [0], [1], [0, 0, 1, 1], [], []>} : vector<8x8xbf16>, vector<8x8xbf16>, vector<8x8xf32> -> vector<8x8xf32>
    %136 = arith.addf %135, %72 : vector<8x8xf32>
    %cst_47 = arith.constant dense<0xFF800000> : vector<8xf32>
    %137 = vector.multi_reduction <maximumf>, %136, %cst_47 [1] : vector<8x8xf32> to vector<8xf32>
    %138 = vector.shape_cast %137 : vector<8xf32> to vector<8x1xf32>
    %139 = vector.broadcast %138 : vector<8x1xf32> to vector<8x8xf32>
    %140 = arith.subf %136, %139 : vector<8x8xf32>
    %141 = math.exp %140 : vector<8x8xf32>
    %cst_48 = arith.constant dense<0.000000e+00> : vector<8xf32>
    %142 = vector.multi_reduction <add>, %141, %cst_48 [1] : vector<8x8xf32> to vector<8xf32>
    %143 = vector.shape_cast %142 : vector<8xf32> to vector<8x1xf32>
    %144 = vector.broadcast %143 : vector<8x1xf32> to vector<8x8xf32>
    %145 = arith.divf %141, %144 : vector<8x8xf32>
    %146 = arith.truncf %145 : vector<8x8xf32> to vector<8x8xbf16>
    %cst_49 = arith.constant dense<0.000000e+00> : vector<8x8xf32>
    %147 = tpu.matmul %146, %133, %cst_49 {dimension_numbers = #tpu.dot_dimension_numbers<[1], [0], [0], [1], [0, 0, 1, 1], [], []>} : vector<8x8xbf16>, vector<8x8xbf16>, vector<8x8xf32> -> vector<8x8xf32>
    %c0_50 = arith.constant 0 : index
    %c24 = arith.constant 24 : index
    %148 = vector.load %arg17[%c0_50, %c24] : memref<8x32xf32, #tpu.memory_space<vmem>>, vector<8x8xf32>
    tpu.vector_store %arg17[%c0_50, %c24], %147 {strides = array<i32>} : memref<8x32xf32, #tpu.memory_space<vmem>>, vector<8x8xf32>,
    %c0_51 = arith.constant 0 : index
    %c0_52 = arith.constant 0 : index
    %149 = vector.load %arg17[%c0_51, %c0_52] : memref<8x32xf32, #tpu.memory_space<vmem>>, vector<8x32xf32>
    %150 = arith.truncf %149 : vector<8x32xf32> to vector<8x32xbf16>
    %c0_53 = arith.constant 0 : index
    %c0_54 = arith.constant 0 : index
    %151 = vector.load %arg8[%c0_53, %c0_54] : memref<32x32xbf16, #tpu.memory_space<vmem>>, vector<32x32xbf16>
    %cst_55 = arith.constant dense<0.000000e+00> : vector<8x32xf32>
    %152 = tpu.matmul %150, %151, %cst_55 {dimension_numbers = #tpu.dot_dimension_numbers<[1], [0], [0], [1], [0, 0, 1, 1], [], []>} : vector<8x32xbf16>, vector<32x32xbf16>, vector<8x32xf32> -> vector<8x32xf32>
    %c0_56 = arith.constant 0 : index
    %c0_57 = arith.constant 0 : index
    %153 = vector.load %arg9[%c0_56, %c0_57] : memref<1x32xf32, #tpu.memory_space<vmem>>, vector<1x32xf32>
    %154 = vector.broadcast %153 : vector<1x32xf32> to vector<8x32xf32>
    %155 = arith.addf %152, %154 : vector<8x32xf32>
    %156 = arith.addf %4, %155 : vector<8x32xf32>
    %c0_58 = arith.constant 0 : index
    %c0_59 = arith.constant 0 : index
    %157 = vector.load %arg10[%c0_58, %c0_59] : memref<1x32xf32, #tpu.memory_space<vmem>>, vector<1x32xf32>
    %c0_60 = arith.constant 0 : index
    %c0_61 = arith.constant 0 : index
    %158 = vector.load %arg11[%c0_60, %c0_61] : memref<1x32xf32, #tpu.memory_space<vmem>>, vector<1x32xf32>
    %cst_62 = arith.constant dense<0.000000e+00> : vector<8xf32>
    %159 = vector.multi_reduction <add>, %156, %cst_62 [1] : vector<8x32xf32> to vector<8xf32>
    %160 = vector.shape_cast %159 : vector<8xf32> to vector<8x1xf32>
    %cst_63 = arith.constant 3.200000e+01 : f32
    %161 = vector.broadcast %cst_63 : f32 to vector<8x1xf32>
    %162 = arith.divf %160, %161 : vector<8x1xf32>
    %163 = vector.broadcast %162 : vector<8x1xf32> to vector<8x32xf32>
    %164 = arith.subf %156, %163 : vector<8x32xf32>
    %165 = arith.mulf %164, %164 : vector<8x32xf32>
    %cst_64 = arith.constant dense<0.000000e+00> : vector<8xf32>
    %166 = vector.multi_reduction <add>, %165, %cst_64 [1] : vector<8x32xf32> to vector<8xf32>
    %167 = vector.shape_cast %166 : vector<8xf32> to vector<8x1xf32>
    %cst_65 = arith.constant 3.200000e+01 : f32
    %168 = vector.broadcast %cst_65 : f32 to vector<8x1xf32>
    %169 = arith.divf %167, %168 : vector<8x1xf32>
    %cst_66 = arith.constant 9.99999974E-6 : f32
    %170 = vector.broadcast %cst_66 : f32 to vector<8x1xf32>
    %171 = arith.addf %169, %170 : vector<8x1xf32>
    %172 = math.rsqrt %171 : vector<8x1xf32>
    %173 = vector.broadcast %172 : vector<8x1xf32> to vector<8x32xf32>
    %174 = arith.mulf %164, %173 : vector<8x32xf32>
    %175 = vector.broadcast %157 : vector<1x32xf32> to vector<8x32xf32>
    %176 = arith.mulf %175, %174 : vector<8x32xf32>
    %177 = vector.broadcast %158 : vector<1x32xf32> to vector<8x32xf32>
    %178 = arith.addf %176, %177 : vector<8x32xf32>
    %179 = arith.truncf %178 : vector<8x32xf32> to vector<8x32xbf16>
    %cst_67 = arith.constant 0.000000e+00 : f32
    %180 = vector.broadcast %cst_67 : f32 to vector<8x32xf32>
    %c0_68 = arith.constant 0 : index
    %c0_69 = arith.constant 0 : index
    %181 = vector.load %arg12[%c0_68, %c0_69] : memref<32x128xbf16, #tpu.memory_space<vmem>>, vector<32x128xbf16>
    %cst_70 = arith.constant dense<0.000000e+00> : vector<8x128xf32>
    %182 = tpu.matmul %179, %181, %cst_70 {dimension_numbers = #tpu.dot_dimension_numbers<[1], [0], [0], [1], [0, 0, 1, 1], [], []>} : vector<8x32xbf16>, vector<32x128xbf16>, vector<8x128xf32> -> vector<8x128xf32>
    %c0_71 = arith.constant 0 : index
    %c0_72 = arith.constant 0 : index
    %183 = vector.load %arg13[%c0_71, %c0_72] : memref<1x128xf32, #tpu.memory_space<vmem>>, vector<1x128xf32>
    %184 = vector.broadcast %183 : vector<1x128xf32> to vector<8x128xf32>
    %185 = arith.addf %182, %184 : vector<8x128xf32>
    %cst_73 = arith.constant 5.000000e-01 : f32
    %186 = vector.broadcast %cst_73 : f32 to vector<8x128xf32>
    %187 = arith.mulf %186, %185 : vector<8x128xf32>
    %cst_74 = arith.constant 0.707106769 : f32
    %188 = vector.broadcast %cst_74 : f32 to vector<8x128xf32>
    %189 = arith.mulf %185, %188 : vector<8x128xf32>
    %190 = math.erf %189 : vector<8x128xf32>
    %cst_75 = arith.constant 1.000000e+00 : f32
    %191 = vector.broadcast %cst_75 : f32 to vector<8x128xf32>
    %192 = arith.addf %191, %190 : vector<8x128xf32>
    %193 = arith.mulf %187, %192 : vector<8x128xf32>
    %194 = arith.truncf %193 : vector<8x128xf32> to vector<8x128xbf16>
    %c0_76 = arith.constant 0 : index
    %c0_77 = arith.constant 0 : index
    %195 = vector.load %arg14[%c0_76, %c0_77] : memref<128x32xbf16, #tpu.memory_space<vmem>>, vector<128x32xbf16>
    %cst_78 = arith.constant dense<0.000000e+00> : vector<8x32xf32>
    %196 = tpu.matmul %194, %195, %cst_78 {dimension_numbers = #tpu.dot_dimension_numbers<[1], [0], [0], [1], [0, 0, 1, 1], [], []>} : vector<8x128xbf16>, vector<128x32xbf16>, vector<8x32xf32> -> vector<8x32xf32>
    %197 = arith.addf %180, %196 : vector<8x32xf32>
    %198 = arith.addf %156, %197 : vector<8x32xf32>
    %c0_79 = arith.constant 0 : index
    %c0_80 = arith.constant 0 : index
    %199 = vector.load %arg15[%c0_79, %c0_80] : memref<1x32xf32, #tpu.memory_space<vmem>>, vector<1x32xf32>
    %200 = vector.broadcast %199 : vector<1x32xf32> to vector<8x32xf32>
    %201 = arith.addf %198, %200 : vector<8x32xf32>
    %c0_81 = arith.constant 0 : index
    %c0_82 = arith.constant 0 : index
    %c0_83 = arith.constant 0 : index
    %202 = vector.load %arg16[%c0_81, %c0_82, %c0_83] : memref<1x8x32xf32, #tpu.memory_space<vmem>>, vector<1x8x32xf32>
    %203 = vector.shape_cast %202 : vector<1x8x32xf32> to vector<8x32xf32>
    %204 = vector.shape_cast %201 : vector<8x32xf32> to vector<1x8x32xf32>
    tpu.vector_store %arg16[%c0_81, %c0_82, %c0_83], %204 {strides = array<i32>} : memref<1x8x32xf32, #tpu.memory_space<vmem>>, vector<1x8x32xf32>,
    return
  }
  func.func @transform_0(%arg0: i32, %arg1: i32) -> (i32, i32, i32) {
    %c0_i32 = arith.constant 0 : i32
    %c0_i32_0 = arith.constant 0 : i32
    %c0_i32_1 = arith.constant 0 : i32
    return %arg0, %c0_i32, %c0_i32_0 : i32, i32, i32
  }
  func.func @transform_1(%arg0: i32, %arg1: i32) -> (i32, i32, i32) {
    %c0_i32 = arith.constant 0 : i32
    %c0_i32_0 = arith.constant 0 : i32
    return %arg0, %arg1, %c0_i32 : i32, i32, i32
  }
  func.func @transform_2(%arg0: i32, %arg1: i32) -> (i32, i32) {
    %c0_i32 = arith.constant 0 : i32
    %c0_i32_0 = arith.constant 0 : i32
    %c0_i32_1 = arith.constant 0 : i32
    return %c0_i32, %c0_i32_0 : i32, i32
  }
  func.func @transform_3(%arg0: i32, %arg1: i32) -> (i32, i32) {
    %c0_i32 = arith.constant 0 : i32
    %c0_i32_0 = arith.constant 0 : i32
    %c0_i32_1 = arith.constant 0 : i32
    return %c0_i32, %c0_i32_0 : i32, i32
  }
  func.func @transform_4(%arg0: i32, %arg1: i32) -> (i32, i32) {
    %c0_i32 = arith.constant 0 : i32
    %c0_i32_0 = arith.constant 0 : i32
    %c0_i32_1 = arith.constant 0 : i32
    return %c0_i32, %c0_i32_0 : i32, i32
  }
  func.func @transform_5(%arg0: i32, %arg1: i32) -> (i32, i32) {
    %c0_i32 = arith.constant 0 : i32
    %c0_i32_0 = arith.constant 0 : i32
    %c0_i32_1 = arith.constant 0 : i32
    return %c0_i32, %c0_i32_0 : i32, i32
  }
  func.func @transform_6(%arg0: i32, %arg1: i32) -> (i32, i32) {
    %c0_i32 = arith.constant 0 : i32
    %c0_i32_0 = arith.constant 0 : i32
    %c0_i32_1 = arith.constant 0 : i32
    return %c0_i32, %c0_i32_0 : i32, i32
  }
  func.func @transform_7(%arg0: i32, %arg1: i32) -> (i32, i32) {
    %c0_i32 = arith.constant 0 : i32
    %c0_i32_0 = arith.constant 0 : i32
    %c0_i32_1 = arith.constant 0 : i32
    return %c0_i32, %c0_i32_0 : i32, i32
  }
  func.func @transform_8(%arg0: i32, %arg1: i32) -> (i32, i32) {
    %c0_i32 = arith.constant 0 : i32
    %c0_i32_0 = arith.constant 0 : i32
    %c0_i32_1 = arith.constant 0 : i32
    return %c0_i32, %c0_i32_0 : i32, i32
  }
  func.func @transform_9(%arg0: i32, %arg1: i32) -> (i32, i32) {
    %c0_i32 = arith.constant 0 : i32
    %c0_i32_0 = arith.constant 0 : i32
    %c0_i32_1 = arith.constant 0 : i32
    return %c0_i32, %c0_i32_0 : i32, i32
  }
  func.func @transform_10(%arg0: i32, %arg1: i32) -> (i32, i32) {
    %c0_i32 = arith.constant 0 : i32
    %c0_i32_0 = arith.constant 0 : i32
    %c0_i32_1 = arith.constant 0 : i32
    return %c0_i32, %c0_i32_0 : i32, i32
  }
  func.func @transform_11(%arg0: i32, %arg1: i32) -> (i32, i32) {
    %c0_i32 = arith.constant 0 : i32
    %c0_i32_0 = arith.constant 0 : i32
    %c0_i32_1 = arith.constant 0 : i32
    return %c0_i32, %c0_i32_0 : i32, i32
  }
  func.func @transform_12(%arg0: i32, %arg1: i32) -> (i32, i32) {
    %c0_i32 = arith.constant 0 : i32
    %c0_i32_0 = arith.constant 0 : i32
    %c0_i32_1 = arith.constant 0 : i32
    return %c0_i32, %c0_i32_0 : i32, i32
  }
  func.func @transform_13(%arg0: i32, %arg1: i32) -> (i32, i32) {
    %c0_i32 = arith.constant 0 : i32
    %c0_i32_0 = arith.constant 0 : i32
    %c0_i32_1 = arith.constant 0 : i32
    return %c0_i32, %c0_i32_0 : i32, i32
  }
  func.func @transform_14(%arg0: i32, %arg1: i32) -> (i32, i32, i32) {
    %c0_i32 = arith.constant 0 : i32
    %c0_i32_0 = arith.constant 0 : i32
    return %arg0, %arg1, %c0_i32 : i32, i32, i32
  }
}

</mosaic_0001>

<bundles_post_ra>
// kernel: tpu_custom_call.1
= control target key start
LH: loop header
LB: loop body
LE: loop exit
PB: predicated region body
PF: predicated region fallthrough
CT: control target
= control target key end

     0   :  { %19 = vsyncpa [#allocation4], 0  ;;  %s2447_s0 = inlined_call_operand.vmem [shape: f32[2,8,32], index: 0, kind: input, shape index: {}]   ;;  %s2448_s1 = inlined_call_operand.vmem [shape: f32[2,8,32], index: 1, kind: input, shape index: {}]   ;;  %s2449_s2 = inlined_call_operand.vmem [shape: f32[1,32], index: 2, kind: input, shape index: {}]   ;;  %s2450_s3 = inlined_call_operand.vmem [shape: f32[1,32], index: 3, kind: input, shape index: {}]   ;;  %s2451_s4 = inlined_call_operand.vmem [shape: bf16[32,96], index: 4, kind: input, shape index: {}]   ;;  %s2452_s5 = inlined_call_operand.vmem [shape: f32[1,96], index: 5, kind: input, shape index: {}]   ;;  %s2453_s6 = inlined_call_operand.vmem [shape: bf16[32,32], index: 6, kind: input, shape index: {}]   ;;  %s2454_s7 = inlined_call_operand.vmem [shape: f32[1,32], index: 7, kind: input, shape index: {}]   ;;  %s2455_s8 = inlined_call_operand.vmem [shape: f32[1,32], index: 8, kind: input, shape index: {}]   ;;  %s2456_s9 = inlined_call_operand.hbm [shape: f32[1,32], index: 9, kind: input, shape index: {}]   ;;  %s2457_s10 = inlined_call_operand.vmem [shape: bf16[32,128], index: 10, kind: input, shape index: {}]   ;;  %s2458_s11 = inlined_call_operand.hbm [shape: f32[1,128], index: 11, kind: input, shape index: {}]   ;;  %s2459_s12 = inlined_call_operand.vmem [shape: bf16[128,32], index: 12, kind: input, shape index: {}]   ;;  %s2460_s13 = inlined_call_operand.vmem [shape: f32[1,32], index: 13, kind: input, shape index: {}]   ;;  %s2461_s14 = inlined_call_operand.hbm [shape: f32[2,8,32], index: 14, kind: output, shape index: {}]  }
   0x1   :  { %20 = vsyncpa [#allocation7], 0 }
   0x2   :  { %21 = vsyncpa [#allocation5], 0 }
   0x3   :  { %23 = vsyncpa [#allocation5 + $0x1], 0  ;;  %s2119_s29 = smov 0   ;;  %s2121_s30 = smov 0  }
   0x4   :  { %s2123_s15 = smov 0   ;;  %s2125_s16 = smov 0  }
   0x5   :  { %s2127_s17 = smov 0   ;;  %s2129_s18 = smov 0  }
   0x6 LB: > { %2469 = sst [smem:[#allocation12_spill]] %s2014_s15  ;;  %s1576_s19 = sadd.s32 4294967295, %s2026_s18   ;;  %s2026_s18 = sphi %s2129_s18, %s29_s18   ;;  %s2022_s17 = sphi %s2127_s17, %s2486_s17   ;;  %s2018_s16 = sphi %s2125_s16, %s2485_s16   ;;  %s2014_s15 = sphi %s2123_s15, %s2484_s15   ;;  %s2010_s30 = sphi %s2121_s30, %s2488_s30   ;;  %s2006_s29 = sphi %s2119_s29, %s2487_s29  }
   0x7   : > { %2470 = sst [smem:[#allocation13_spill]] %s2022_s17  ;;  %s1577_s20 = sadd.s32 4294967294, %s2026_s18  }
   0x8   : > { %s41_s21 = sadd.s32 1, %s2022_s17  ;;  %s356_s22 = sadd.s32 1, %s2014_s15 }
   0x9   : > { %p43_p0 = scmp.ge.s32.totalorder %s41_s21, 2  ;;  %p366_p1 = scmp.ne.s32.totalorder %s2014_s15, %s2010_s30 }
   0xa   : > { %p367_p2 = scmp.eq.s32.totalorder %s1576_s19, 1  ;;  %p372_p3 = scmp.ne.s32.totalorder %s2010_s30, %s2006_s29 }
   0xb   : > { %s2490_s21 = smov (%p43_p0, %s41_s21), 0  ;;  %p373_p5 = scmp.eq.s32.totalorder %s1577_s20, 1 }
   0xc   : > { %2471 = sst [smem:[#allocation14_spill]] %s2490_s21  ;;  %p2159_p4 = por %p367_p2, %p366_p1 }
   0xd   : > { %s351_s24 = ssub.s32 %s2022_s17, %s2490_s21  ;;  %p1578_p6 = scmp.ge.s32.totalorder %s2026_s18, 1 }
   0xe   : > { %s2472_s23 = scalar_select %p2159_p4, 1, 0 }
   0xf   : > { %p354_p7 = scmp.eq.s32.totalorder %s351_s24, 0  ;;  %p2166_p8 = por %p373_p5, %p372_p3 }
  0x10   : > { %p380_p9 = scmp.lt.s32.totalorder %s2026_s18, 3  ;;  %p2178_p11 = scmp.eq.s32.totalorder %s1576_s19, 0 }
  0x11   : > { %s2473_s25 = scalar_select %p2166_p8, 1, 0 }
  0x12   : > { %s2172_s26 = scalar_select %p354_p7, %s2014_s15, %s356_s22  }
  0x13   : > { %2474 = sst [smem:[#allocation15_spill]] %s2473_s25  ;;  %p2174_p10 = pnand %p1578_p6, %p380_p9 }
  0x14   : > { %2475 = sst [smem:[#allocation16_spill]] %s2172_s26  ;;  %s2028_s20 = smov [#allocation3]  }
  0x15   : > { %s2477_s28 = scalar_select %p2178_p11, 1, 0 }
  0x16   : > { %p1773_p12 = pneg %p2174_p10  ;;  %s414_s24 = sshll.u32 %s2028_s20, 4  ;;  %s415_s24 = int_to_ptr.vmem [resolvable:$true] %s414_s24 }
  0x17   : > { %s2029_s21 = smov [#allocation6]   ;;  %s1901_s19 = scalar_lea.vmem %s415_s24, 16 }
  0x18   : > { %s428_s17 = sshll.u32 %s2029_s21, 4  ;;  %p2186_p13 = pnand %p2178_p11, %p1773_p12  ;;  %s429_s17 = int_to_ptr.vmem [resolvable:$true] %s428_s17 }
  0x19   : > { %p1902_p1 = scmp.ne.s32.totalorder %s415_s24, %s1901_s19  ;;  %s1908_s20 = scalar_lea.vmem %s415_s24, 32 }
  0x1a   : > { %p1892_p0 = pneg %p2186_p13  ;;  %p1909_p5 = scmp.lt.s32.totalorder %s415_s24, %s415_s24 }
  0x1b   : > { %p1910_p6 = scmp.lt.s32.totalorder %s1908_s20, %s1901_s19 }
  0x1c   : > { %p1904_p2 = pnand %p1902_p1, %p1892_p0 }
  0x1d   : > { %p1911_p7 = por %p1910_p6, %p1909_p5 }
  0x1e   : > { %p1905_p3 = pneg %p1904_p2 }
  0x20   : > { %p1912_p9 = pnand %p1911_p7, %p1905_p3 }
  0x22   : > { %1915 = shalt.err (!%p1912_p9)
}
  0x23   : > { %1776 = dma.hbm_to_vmem [thread:$0]  (!%p2186_p13), %s2456_s9, 16, %s415_s24, [#allocation4]  }
  0x24   : > { %s1927_s15 = scalar_lea.vmem %s429_s17, 16  ;;  %s1934_s25 = scalar_lea.vmem %s429_s17, 32 }
  0x25   : > { %p1928_p12 = scmp.ne.s32.totalorder %s429_s17, %s1927_s15  ;;  %p1935_p2 = scmp.lt.s32.totalorder %s429_s17, %s429_s17 }
  0x26   : > { %p1936_p4 = scmp.lt.s32.totalorder %s1934_s25, %s1927_s15 }
  0x27   : > { %p1930_p8 = pnand %p1928_p12, %p1892_p0 }
  0x28   : > { %p1937_p11 = por %p1936_p4, %p1935_p2 }
  0x29   : > { %p1931_p1 = pneg %p1930_p8 }
  0x2b   : > { %p1938_p5 = pnand %p1937_p11, %p1931_p1 }
  0x2d   : > { %1941 = shalt.err (!%p1938_p5)
}
  0x2e   : > { %1779 = dma.hbm_to_vmem [thread:$0]  (!%p2186_p13), %s2458_s11, 16, %s429_s17, [#allocation7]  }
  0x2f   : > { %464 = sbr.rel (%p2174_p10) target bundleno = 2478 (0x9ae), region = 76  ;;  %p2479_p3 = scmp.ne.s32.totalorder (!%p2174_p10), %s2477_s28, 0 }
  0x34   : > { %1993 = dma.done.wait (%p2479_p3), [#allocation4], 16  }
  0x35   : > { %1995 = vsyncadd (%p2479_p3), [#allocation4], 4294967280 }
  0x36   : > { %1997 = dma.done.wait (%p2479_p3), [#allocation7], 16  }
  0x37   : > { %1999 = vsyncadd (%p2479_p3), [#allocation7], 4294967280  ;;  %p520_p4 = scmp.lt.s32.totalorder %s2018_s16, 1  ;;  %vm537_vm0 = vcmask 261120   ;;  %v1852_v4 = vld [vmem:[%s2451_s4 + $0x8] sm:$0xff]   ;;  %s2030_s20 = smov 96   ;;  %v703_v62 = vlaneseq }
  0x38   : > { %v1853_v15 = vld [vmem:[%s2451_s4] sm:$0xff]   ;;  %v2031_v17 = vmov 0.0   ;;  %vm2032_vm1 = vmmov 0   ;;  %vm712_vm2 = vcmask 64512   ;;  %s2033_s28 = smov 120   ;;  %s2034_s19 = smov 112  }
  0x39   : > { %s521_s15 = scalar_select %p520_p4, %s2018_s16, 1  ;;  %1663 = vmatprep.subr.bf16.mxu1 %v2031_v17  ;;  %1667 = vmatprep.mubr.msk.bf16.mxu1 %vm2032_vm1, %v2031_v17  ;;  %v1590_v18 = vld [vmem:[%s2452_s5] ss:$0 sm:$0xff]  ;;  %v704_v63 = vshrl.u32 %v703_v62, 7  ;;  %vm777_vm4 = vcmask 1043456   ;;  %vm937_vm5 = vcmask 130112  }
  0x3a   : > { %1691 = vmatprep.subr.bf16.mxu0 %v2031_v17  ;;  %1693 = vmatprep.mubr.msk.bf16.mxu0 %vm2032_vm1, %v2031_v17  ;;  %v1588_v27 = vld [vmem:[%s2449_s2] ss:$0 sm:$0xff]  ;;  %s2039_s25 = smov 88   ;;  %s2040_s26 = smov 8   ;;  %vm1053_vm6 = vcmask 195712   ;;  %vm1169_vm7 = vcmask 261312  }
  0x3b   : > { %s1586_s17 = sshll.u32 %s521_s15, 3  ;;  %v1589_v29 = vld [vmem:[%s2450_s3] ss:$0 sm:$0xff]  ;;  %s2035_s15 = smov 104  }
  0x3c   : > { %s523_s27 = scalar_lea.vmem %s2447_s0, %s1586_s17  ;;  %s530_s21 = scalar_lea.vmem %s2448_s1, %s1586_s17 }
  0x3d   : > { %v533_v0 = vld [vmem:[%s523_s27] sm:$0xff]  ;;  %s2038_s17 = smov 72   ;;  %s1623_s24 = sshll.u32 %s2018_s16, 7 }
  0x3e   : > { %v2226_v1 = vld [vmem:[%s530_s21] sm:$0xff]  ;;  %v538_v2 = vsel %vm537_vm0, %v533_v0, 0.0  ;;  %p2480_p10 = scmp.ne.s32.totalorder %s2472_s23, 0 }
  0x3f   : > { %v567_v3 = vsel %vm537_vm0, %v2226_v1, 0.0  ;;  %539 = vadd.xlane.f32.xlu0 %v538_v2  ;;  %v2036_v2 = vmov -1e+30  }
  0x43   : > { %568 = vadd.xlane.f32.xlu0 %v567_v3 }
  0x59   : > { %605 = vrot.lane.b32.xlu0 %v1852_v4, %s2030_s20 }
  0xc8   : > { %v540_v5 = vpop.xlane.xlu0 %539 }
  0xc9   : > { %v542_v6 = vmul.f32 0.03125, %v540_v5 }
  0xcb   : > { %v543_v7 = vsub.f32 %v533_v0, %v542_v6  ;;  %v708_v0 = vand.u32 127, %v703_v62 }
  0xcc   : > { %v569_v8 = vpop.xlane.xlu0 %568 }
  0xcd   : > { %v570_v9 = vmul.f32 0.03125, %v569_v8  ;;  %v544_v10 = vmul.f32 %v543_v7, %v543_v7  ;;  %vm709_vm3 = vcmp.le.s32.totalorder %v708_v0, %v704_v63 }
  0xce   : > { %v710_v3 = vsel %vm709_vm3, 0.0, %v2036_v2 }
  0xcf   : > { %v571_v11 = vsub.f32 %v2226_v1, %v570_v9  ;;  %v545_v12 = vsel %vm537_vm0, %v544_v10, 0.0 }
  0xd0   : > { %546 = vadd.xlane.f32.xlu1 %v545_v12  ;;  %v606_v16 = vpop.permute.xlu0 %605 }
  0xd1   : > { %v572_v13 = vmul.f32 %v571_v11, %v571_v11  ;;  %1664 = vmatpush3.bf16.msra.mxu1 %v606_v16 }
  0xd2   : > { %1665 = vmatprep.subr.bf16.mxu1 %v2031_v17 }
  0xd3   : > { %v573_v14 = vsel %vm537_vm0, %v572_v13, 0.0 }
  0xd4   : > { %574 = vadd.xlane.f32.xlu1 %v573_v14 }
  0xe5   : > { %603 = vrot.lane.b32.xlu1 %v1853_v15, %s2030_s20 }
  0xe9   : > { %609 = vrot.lane.b32.xlu1 %v1590_v18, %s2030_s20 }
 0x159   : > { %v547_v19 = vpop.xlane.xlu1 %546 }
 0x15a   : > { %v548_v20 = vmul.f32 0.03125, %v547_v19 }
 0x15c   : > { %v549_v21 = vadd.f32 1e-05, %v548_v20 }
 0x15d   : > { %v575_v22 = vpop.xlane.xlu1 %574 }
 0x15e   : > { %1866 = vrsqrt.f32 %v549_v21  ;;  %v576_v23 = vmul.f32 0.03125, %v575_v22 }
 0x160   : > { %v577_v24 = vadd.f32 1e-05, %v576_v23 }
 0x161   : > { %v604_v25 = vpop.permute.xlu1 %603 }
 0x162   : > { %1868 = vrsqrt.f32 %v577_v24  ;;  %1666 = vmatpush3.bf16.msra.mxu1 %v604_v25 }
 0x163   : > { %1671 = vmatprep.subr.bf16.mxu1 %v2031_v17 }
 0x165   : > { %v610_v38 = vpop.permute.xlu1 %609 }
 0x16b   : > { %v1867_v26 = vpop.eup %1866 }
 0x16c   : > { %v551_v28 = vmul.f32 %v1867_v26, %v543_v7 }
 0x16e   : > { %v558_v30 = vmul.f32 %v1588_v27, %v551_v28 }
 0x16f   : > { %v1869_v31 = vpop.eup %1868 }
 0x170   : > { %v565_v32 = vadd.f32 %v1589_v29, %v558_v30  ;;  %v579_v33 = vmul.f32 %v1869_v31, %v571_v11 }
 0x172   : > { %v566_v34 = vpack.c.bf16 %v565_v32, %v565_v32  ;;  %v580_v35 = vmul.f32 %v1588_v27, %v579_v33 }
 0x174   : > { %1668 = vmatmul.mubr.msk.bf16.vlgmr.msra.gmra.mxu1 %vm537_vm0, %v566_v34  ;;  %v581_v36 = vadd.f32 %v1589_v29, %v580_v35 }
 0x175   : > { %1672 = vmatpush3.bf16.msra.mxu1 %v1852_v4  ;;  %1675 = vmatprep.mubr.msk.bf16.mxu1 %vm2032_vm1, %v2031_v17 }
 0x176   : > { %1673 = vmatprep.subr.bf16.mxu1 %v2031_v17  ;;  %v582_v37 = vpack.c.bf16 %v581_v36, %v581_v36 }
 0x179   : > { %1674 = vmatpush3.bf16.msra.mxu1 %v1853_v15 }
 0x17a   : > { %1679 = vmatprep.subr.bf16.mxu1 %v2031_v17 }
 0x17c   : > { %1676 = vmatmul.mubr.msk.bf16.vlgmr.msra.gmra.mxu1 %vm537_vm0, %v582_v37 }
 0x17d   : > { %1681 = vmatprep.mubr.msk.bf16.mxu1 %vm2032_vm1, %v2031_v17 }
 0x234   : > { %v649_v39 = vpop.f32.mrf.mxu1 }
 0x235   : > { %v650_v40 = vadd.f32 %v649_v39, %v610_v38 }
 0x236   : > { %v1669_v41 = vpop.f32.mrf.mxu1 }
 0x237   : > { %v2268_v42 = vpack.c.bf16 %v650_v40, %v650_v40 }
 0x238   : > { %v652_v43 = vpop.f32.mrf.mxu1 }
 0x239   : > { %825 = vrot.lane.b32.xlu1 %v2268_v42, %s2033_s28  ;;  %v717_v44 = vsel %vm712_vm2, %v2268_v42, 0 }
 0x23a   : > { %v1670_v45 = vpop.f32.mrf.mxu1  ;;  %1680 = vmatpush3.bf16.xpose.msra.mxu1 %v717_v44 }
 0x23b   : > { %1685 = vmatprep.subr.bf16.mxu1 %v2031_v17 }
 0x23c   : > { %v695_v46 = vpop.f32.mrf.mxu1 }
 0x23d   : > { %v696_v47 = vadd.f32 %v1590_v18, %v695_v46  ;;  %941 = vrot.lane.b32.xlu1 %v2268_v42, %s2034_s19 }
 0x23e   : > { %v1677_v48 = vpop.f32.mrf.mxu1 }
 0x23f   : > { %v701_v49 = vmul.f32 0.35355338, %v696_v47 }
 0x240   : > { %v698_v50 = vpop.f32.mrf.mxu1 }
 0x241   : > { %v711_v51 = vpack.c.bf16 %v701_v49, %v701_v49  ;;  %1057 = vrot.lane.b32.xlu1 %v2268_v42, %s2035_s15 }
 0x242   : > { %v1678_v52 = vpop.f32.mrf.mxu1 }
 0x243   : > { %823 = vrot.lane.b32.xlu0 %v711_v51, %s2033_s28  ;;  %1682 = vmatmul.mubr.msk.bf16.vlgmr.msra.gmra.mxu1 %vm712_vm2, %v711_v51  ;;  %s2041_s28 = smov 16  }
 0x244   : > { %1687 = vmatprep.mubr.msk.bf16.mxu1 %vm2032_vm1, %v2031_v17 }
 0x247   : > { %939 = vrot.lane.b32.xlu0 %v711_v51, %s2034_s19  ;;  %s2042_s19 = smov 24  }
 0x24b   : > { %1055 = vrot.lane.b32.xlu0 %v711_v51, %s2035_s15  ;;  %s2400_s15 = scalar_lea.hbm %s2461_s14, %s1623_s24 }
 0x2ab   : > { %v826_v53 = vpop.permute.xlu1 %825 }
 0x2ac   : > { %v831_v54 = vsel %vm712_vm2, %v826_v53, 0 }
 0x2ad   : > { %1692 = vmatpush3.bf16.xpose.msra.mxu0 %v831_v54 }
 0x2ae   : > { %1703 = vmatprep.subr.bf16.mxu0 %v2031_v17 }
 0x2af   : > { %v942_v55 = vpop.permute.xlu1 %941 }
 0x2b0   : > { %v947_v57 = vsel %vm712_vm2, %v942_v55, 0 }
 0x2b3   : > { %v1058_v58 = vpop.permute.xlu1 %1057 }
 0x2b4   : > { %v1063_v60 = vsel %vm712_vm2, %v1058_v58, 0 }
 0x2b5   : > { %v824_v56 = vpop.permute.xlu0 %823 }
 0x2b6   : > { %1694 = vmatmul.mubr.msk.bf16.vlgmr.msra.gmra.mxu0 %vm712_vm2, %v824_v56 }
 0x2b7   : > { %1704 = vmatpush3.bf16.xpose.msra.mxu0 %v947_v57  ;;  %1705 = vmatprep.mubr.msk.bf16.mxu0 %vm2032_vm1, %v2031_v17 }
 0x2b8   : > { %1715 = vmatprep.subr.bf16.mxu0 %v2031_v17 }
 0x2b9   : > { %v940_v59 = vpop.permute.xlu0 %939 }
 0x2bd   : > { %v1056_v61 = vpop.permute.xlu0 %1055 }
 0x2be   : > { %1706 = vmatmul.mubr.msk.bf16.vlgmr.msra.gmra.mxu0 %vm712_vm2, %v940_v59 }
 0x2bf   : > { %1716 = vmatpush3.bf16.xpose.msra.mxu0 %v1063_v60  ;;  %1717 = vmatprep.mubr.msk.bf16.mxu0 %vm2032_vm1, %v2031_v17 }
 0x2c0   : > { %1727 = vmatprep.subr.bf16.mxu0 %v2031_v17 }
 0x2c6   : > { %1718 = vmatmul.mubr.msk.bf16.vlgmr.msra.gmra.mxu0 %vm712_vm2, %v1056_v61 }
 0x2c7   : > { %1731 = vmatprep.mubr.msk.bf16.mxu0 %vm2032_vm1, %v2031_v17 }
 0x303   : > { %v753_v4 = vpop.f32.mrf.mxu1 }
 0x304   : > { %v754_v5 = vadd.f32 %v753_v4, %v710_v3 }
 0x305   : > { %v1683_v6 = vpop.f32.mrf.mxu1 }
 0x306   : > { %v759_v7 = vsel %vm712_vm2, %v754_v5, -inf }
 0x307   : > { %760 = vmax.xlane.f32.xlu1 %v759_v7  ;;  %v756_v8 = vpop.f32.mrf.mxu1 }
 0x309   : > { %v1684_v9 = vpop.f32.mrf.mxu1 }
 0x376   : > { %v867_v10 = vpop.f32.mrf.mxu0 }
 0x377   : > { %v868_v11 = vadd.f32 %v867_v10, %v710_v3 }
 0x378   : > { %v1695_v12 = vpop.f32.mrf.mxu0 }
 0x379   : > { %v873_v13 = vsel %vm712_vm2, %v868_v11, -inf }
 0x37a   : > { %874 = vmax.xlane.f32.xlu0 %v873_v13  ;;  %v870_v14 = vpop.f32.mrf.mxu0 }
 0x37c   : > { %v1696_v15 = vpop.f32.mrf.mxu0 }
 0x37e   : > { %v983_v16 = vpop.f32.mrf.mxu0 }
 0x37f   : > { %v984_v18 = vadd.f32 %v983_v16, %v710_v3 }
 0x380   : > { %v1707_v19 = vpop.f32.mrf.mxu0 }
 0x381   : > { %v989_v20 = vsel %vm712_vm2, %v984_v18, -inf }
 0x382   : > { %990 = vmax.xlane.f32.xlu0 %v989_v20  ;;  %v986_v21 = vpop.f32.mrf.mxu0  ;;  %v1855_v20 = vld [vmem:[%s2453_s6] sm:$0xff]  }
 0x384   : > { %v1708_v22 = vpop.f32.mrf.mxu0 }
 0x386   : > { %v1099_v23 = vpop.f32.mrf.mxu0 }
 0x387   : > { %v1100_v24 = vadd.f32 %v1099_v23, %v710_v3 }
 0x388   : > { %v1719_v25 = vpop.f32.mrf.mxu0 }
 0x389   : > { %v1105_v26 = vsel %vm712_vm2, %v1100_v24, -inf }
 0x38a   : > { %1106 = vmax.xlane.f32.xlu0 %v1105_v26  ;;  %v1102_v27 = vpop.f32.mrf.mxu0 }
 0x38c   : > { %v1720_v28 = vpop.f32.mrf.mxu0 }
 0x390   : > { %v761_v29 = vpop.xlane.xlu1 %760 }
 0x391   : > { %v762_v30 = vsub.f32 %v754_v5, %v761_v29 }
 0x393   : > { %v763_v31 = vmul.f32 1.442695, %v762_v30 }
 0x395   : > { %1870 = vpow2.f32 %v763_v31 }
 0x3a2   : > { %v1871_v32 = vpop.eup %1870 }
 0x3a3   : > { %v765_v33 = vsel %vm712_vm2, %v1871_v32, 0.0 }
 0x3a4   : > { %766 = vadd.xlane.f32.xlu1 %v765_v33 }
 0x3b5   : > { %772 = vrot.lane.b32.xlu1 %v2268_v42, %s2030_s20  ;;  %s2037_s20 = smov 80  }
 0x403   : > { %v875_v34 = vpop.xlane.xlu0 %874 }
 0x404   : > { %v876_v35 = vsub.f32 %v868_v11, %v875_v34  ;;  %v1603_v34 = vld [vmem:[%s2454_s7] ss:$0 sm:$0xff] }
 0x406   : > { %v877_v36 = vmul.f32 1.442695, %v876_v35 }
 0x408   : > { %1872 = vpow2.f32 %v877_v36 }
 0x40b   : > { %v991_v37 = vpop.xlane.xlu0 %990 }
 0x40c   : > { %v992_v38 = vsub.f32 %v984_v18, %v991_v37  ;;  %v1854_v18 = vld [vmem:[%s2453_s6 + $0x8] sm:$0xff]  }
 0x40d   : > { %1728 = vmatpush3.bf16.msra.mxu0 %v1854_v18 }
 0x40e   : > { %v993_v39 = vmul.f32 1.442695, %v992_v38  ;;  %1729 = vmatprep.subr.bf16.mxu0 %v2031_v17 }
 0x410   : > { %1874 = vpow2.f32 %v993_v39 }
 0x411   : > { %1730 = vmatpush3.bf16.msra.mxu0 %v1855_v20 }
 0x412   : > { %1743 = vmatprep.subr.bf16.mxu0 %v2031_v17 }
 0x413   : > { %v1107_v40 = vpop.xlane.xlu0 %1106 }
 0x414   : > { %v1108_v41 = vsub.f32 %v1100_v24, %v1107_v40 }
 0x415   : > { %v1873_v43 = vpop.eup %1872 }
 0x416   : > { %v1109_v44 = vmul.f32 1.442695, %v1108_v41  ;;  %v879_v45 = vsel %vm712_vm2, %v1873_v43, 0.0 }
 0x417   : > { %880 = vadd.xlane.f32.xlu0 %v879_v45 }
 0x418   : > { %1876 = vpow2.f32 %v1109_v44 }
 0x41d   : > { %v1875_v46 = vpop.eup %1874 }
 0x41e   : > { %v995_v47 = vsel %vm712_vm2, %v1875_v46, 0.0 }
 0x41f   : > { %996 = vadd.xlane.f32.xlu1 %v995_v47 }
 0x425   : > { %v1877_v48 = vpop.eup %1876 }
 0x426   : > { %v1111_v49 = vsel %vm712_vm2, %v1877_v48, 0.0 }
 0x427   : > { %1112 = vadd.xlane.f32.xlu0 %v1111_v49  ;;  %v1858_v49 = vld [vmem:[%s2459_s12 + $0x38] sm:$0xff]  }
 0x42d   : > { %v767_v50 = vpop.xlane.xlu1 %766 }
 0x42e   : > { %1878 = vrcp.f32 %v767_v50  ;;  %v1859_v50 = vld [vmem:[%s2459_s12 + $0x30] sm:$0xff]  }
 0x430   : > { %1001 = vrot.lane.b32.xlu1 %v2268_v42, %s2037_s20 }
 0x431   : > { %v773_v51 = vpop.permute.xlu1 %772 }
 0x432   : > { %v779_v52 = vsel %vm777_vm4, %v773_v51, 0 }
 0x433   : > { %1686 = vmatpush3.bf16.msra.mxu1 %v779_v52 }
 0x434   : > { %1117 = vrot.lane.b32.xlu1 %v2268_v42, %s2038_s17  ;;  %1697 = vmatprep.subr.bf16.mxu1 %v2031_v17  ;;  %s517_s17 = sand.u32 1, %s2010_s30  }
 0x435   : > { %s1457_s16 = scalar_lea.sflag [#allocation5], %s517_s17 }
 0x43b   : > { %v1879_v53 = vpop.eup %1878 }
 0x43c   : > { %v769_v54 = vmul.f32 %v1879_v53, %v1871_v32 }
 0x43d   : > { %885 = vrot.lane.b32.xlu0 %v2268_v42, %s2039_s25  ;;  %s1585_s25 = sshll.u32 %s517_s17, 3 }
 0x43e   : > { %v770_v55 = vpack.c.bf16 %v769_v54, %v769_v54  ;;  %s519_s22 = scalar_lea.vmem [#allocation8], %s1585_s25  ;;  %s2043_s25 = smov [#allocation8]  }
 0x43f   : > { %s1471_s21 = sshll.u32 %s519_s22, 4  ;;  %s2402_s21 = int_to_ptr.vmem [resolvable:$true] %s1471_s21 }
 0x440   : > { %1688 = vmatmul.mubr.msk.bf16.vlgmr.msra.gmra.mxu1 %vm712_vm2, %v770_v55  ;;  %v1607_v55 = vld [vmem:[%s2455_s8] ss:$0 sm:$0xff]  ;;  %s1942_s20 = scalar_lea.vmem %s2402_s21, 128 }
 0x441   : > { %1699 = vmatprep.mubr.msk.bf16.mxu1 %vm2032_vm1, %v2031_v17  ;;  %p1943_p8 = scmp.ne.s32.totalorder %s2402_s21, %s1942_s20 }
 0x443   : > { %p1944_p11 = pnand %p1943_p8, %p2480_p10 }
 0x445   : > { %p1945_p13 = pneg %p1944_p11 }
 0x4a0   : > { %v881_v56 = vpop.xlane.xlu0 %880 }
 0x4a1   : > { %1880 = vrcp.f32 %v881_v56 }
 0x4a8   : > { %v997_v57 = vpop.xlane.xlu1 %996 }
 0x4a9   : > { %1882 = vrcp.f32 %v997_v57  ;;  %v1608_v57 = vld [vmem:[#allocation3] ss:$0 sm:$0xff] }
 0x4ac   : > { %v1002_v63 = vpop.permute.xlu1 %1001 }
 0x4ad   : > { %v1007_v2 = vsel %vm777_vm4, %v1002_v63, 0  ;;  %v1862_v63 = vld [vmem:[%s2459_s12 + $0x18] sm:$0xff]  }
 0x4ae   : > { %v1881_v58 = vpop.eup %1880 }
 0x4af   : > { %v883_v60 = vmul.f32 %v1881_v58, %v1873_v43 }
 0x4b0   : > { %v1113_v59 = vpop.xlane.xlu0 %1112  ;;  %v1118_v4 = vpop.permute.xlu1 %1117 }
 0x4b1   : > { %1884 = vrcp.f32 %v1113_v59  ;;  %v884_v42 = vpack.c.bf16 %v883_v60, %v883_v60  ;;  %v1123_v7 = vsel %vm777_vm4, %v1118_v4, 0 }
 0x4b4   : > { %v886_v61 = vpop.permute.xlu0 %885 }
 0x4b5   : > { %v891_v62 = vsel %vm777_vm4, %v886_v61, 0  ;;  %v1860_v61 = vld [vmem:[%s2459_s12 + $0x28] sm:$0xff]  }
 0x4b6   : > { %1698 = vmatpush3.bf16.msra.mxu1 %v891_v62  ;;  %v1883_v0 = vpop.eup %1882  ;;  %v1861_v62 = vld [vmem:[%s2459_s12 + $0x20] sm:$0xff]  }
 0x4b7   : > { %1709 = vmatprep.subr.bf16.mxu1 %v2031_v17  ;;  %v999_v3 = vmul.f32 %v1883_v0, %v1875_v46  ;;  %v1864_v0 = vld [vmem:[%s2459_s12 + $0x8] sm:$0xff]  }
 0x4b9   : > { %1700 = vmatmul.mubr.msk.bf16.vlgmr.msra.gmra.mxu1 %vm712_vm2, %v884_v42  ;;  %v1000_v5 = vpack.c.bf16 %v999_v3, %v999_v3  ;;  %v1863_v42 = vld [vmem:[%s2459_s12 + $0x10] sm:$0xff]   ;;  %v1609_v3 = vld [vmem:[#allocation6] ss:$0 sm:$0xff] }
 0x4ba   : > { %1710 = vmatpush3.bf16.msra.mxu1 %v1007_v2  ;;  %1711 = vmatprep.mubr.msk.bf16.mxu1 %vm2032_vm1, %v2031_v17  ;;  %v1865_v2 = vld [vmem:[%s2459_s12] sm:$0xff]  }
 0x4bb   : > { %1721 = vmatprep.subr.bf16.mxu1 %v2031_v17 }
 0x4be   : > { %v1885_v6 = vpop.eup %1884 }
 0x4bf   : > { %v1115_v8 = vmul.f32 %v1885_v6, %v1877_v48  ;;  %v1856_v48 = vld [vmem:[%s2457_s10 + $0x8] sm:$0xff]  }
 0x4c1   : > { %1712 = vmatmul.mubr.msk.bf16.vlgmr.msra.gmra.mxu1 %vm712_vm2, %v1000_v5  ;;  %v1116_v9 = vpack.c.bf16 %v1115_v8, %v1115_v8 }
 0x4c2   : > { %1722 = vmatpush3.bf16.msra.mxu1 %v1123_v7  ;;  %1723 = vmatprep.mubr.msk.bf16.mxu1 %vm2032_vm1, %v2031_v17 }
 0x4c3   : > { %1735 = vmatprep.subr.bf16.mxu1 %v2031_v17 }
 0x4c9   : > { %1724 = vmatmul.mubr.msk.bf16.vlgmr.msra.gmra.mxu1 %vm712_vm2, %v1116_v9 }
 0x4ca   : > { %1739 = vmatprep.mubr.msk.bf16.mxu1 %vm2032_vm1, %v2031_v17  ;;  %1736 = vmatpush3.bf16.msra.mxu1 %v1856_v48 }
 0x4cb   : > { %1737 = vmatprep.subr.bf16.mxu1 %v2031_v17 }
 0x500   : > { %v815_v10 = vpop.f32.mrf.mxu1 }
 0x501   : > { %821 = vst.msk [vmem:[#allocation2] sm:$0xff] %vm712_vm2, %v815_v10 }
 0x502   : > { %v1689_v11 = vpop.f32.mrf.mxu1 }
 0x504   : > { %v818_v12 = vpop.f32.mrf.mxu1 }
 0x506   : > { %v1690_v13 = vpop.f32.mrf.mxu1 }
 0x579   : > { %v927_v14 = vpop.f32.mrf.mxu1 }
 0x57a   : > { %934 = vrot.lane.b32.xlu1 %v927_v14, %s2040_s26  ;;  %s1946_s26 = sshll.u32 %s2043_s25, 4  ;;  %s1947_s26 = int_to_ptr.vmem [resolvable:$false] %s1946_s26 }
 0x57b   : > { %v1701_v15 = vpop.f32.mrf.mxu1  ;;  %s1948_s27 = scalar_lea.vmem %s1947_s26, 256  ;;  %p1949_p0 = scmp.lt.s32.totalorder %s2402_s21, %s1947_s26 }
 0x57c   : > { %v1621_v15 = vld [vmem:[%s2460_s13] ss:$0 sm:$0xff]  ;;  %p1950_p6 = scmp.lt.s32.totalorder %s1948_s27, %s1942_s20 }
 0x57d   : > { %v930_v16 = vpop.f32.mrf.mxu1 }
 0x57e   : > { %p1951_p7 = por %p1950_p6, %p1949_p0 }
 0x57f   : > { %v1702_v19 = vpop.f32.mrf.mxu1 }
 0x580   : > { %p1952_p9 = pnand %p1951_p7, %p1945_p13 }
 0x581   : > { %v1043_v21 = vpop.f32.mrf.mxu1 }
 0x582   : > { %1050 = vrot.lane.b32.xlu0 %v1043_v21, %s2041_s28 }
 0x583   : > { %v1713_v22 = vpop.f32.mrf.mxu1 }
 0x585   : > { %v1046_v23 = vpop.f32.mrf.mxu1 }
 0x587   : > { %v1714_v24 = vpop.f32.mrf.mxu1 }
 0x589   : > { %v1159_v25 = vpop.f32.mrf.mxu1 }
 0x58a   : > { %1166 = vrot.lane.b32.xlu1 %v1159_v25, %s2042_s19 }
 0x58b   : > { %v1725_v26 = vpop.f32.mrf.mxu1 }
 0x58d   : > { %v1162_v27 = vpop.f32.mrf.mxu1 }
 0x58f   : > { %v1726_v28 = vpop.f32.mrf.mxu1 }
 0x5ec   : > { %v935_v29 = vpop.permute.xlu1 %934 }
 0x5ed   : > { %938 = vst.msk [vmem:[#allocation2] sm:$0xff] %vm937_vm5, %v935_v29 }
 0x5f4   : > { %v1051_v30 = vpop.permute.xlu0 %1050 }
 0x5f5   : > { %1054 = vst.msk [vmem:[#allocation2] sm:$0xff] %vm1053_vm6, %v1051_v30 }
 0x5fc   : > { %v1167_v31 = vpop.permute.xlu1 %1166 }
 0x5fd   : > { %1170 = vst.msk [vmem:[#allocation2] sm:$0xff] %vm1169_vm7, %v1167_v31 }
 0x604   : > { %v1171_v32 = vld [vmem:[#allocation2] sm:$0xff] }
 0x605   : > { %v1172_v33 = vpack.c.bf16 %v1171_v32, %v1171_v32 }
 0x607   : > { %1732 = vmatmul.mubr.msk.bf16.vlgmr.msra.gmra.mxu0 %vm537_vm0, %v1172_v33 }
 0x608   : > { %1759 = vmatprep.mubr.msk.bf16.mxu0 %vm2032_vm1, %v2031_v17  ;;  %1744 = vmatpush3.bf16.msra.mxu0 %v1858_v49 }
 0x609   : > { %1745 = vmatprep.subr.bf16.mxu0 %v2031_v17 }
 0x60c   : > { %1746 = vmatpush3.bf16.msra.mxu0 %v1859_v50 }
 0x60d   : > { %1747 = vmatprep.subr.bf16.mxu0 %v2031_v17 }
 0x610   : > { %1748 = vmatpush3.bf16.msra.mxu0 %v1860_v61 }
 0x611   : > { %1749 = vmatprep.subr.bf16.mxu0 %v2031_v17 }
 0x614   : > { %1750 = vmatpush3.bf16.msra.mxu0 %v1861_v62 }
 0x615   : > { %1751 = vmatprep.subr.bf16.mxu0 %v2031_v17 }
 0x618   : > { %1752 = vmatpush3.bf16.msra.mxu0 %v1862_v63 }
 0x619   : > { %1753 = vmatprep.subr.bf16.mxu0 %v2031_v17 }
 0x61c   : > { %1754 = vmatpush3.bf16.msra.mxu0 %v1863_v42 }
 0x61d   : > { %1755 = vmatprep.subr.bf16.mxu0 %v2031_v17 }
 0x620   : > { %1756 = vmatpush3.bf16.msra.mxu0 %v1864_v0 }
 0x621   : > { %1757 = vmatprep.subr.bf16.mxu0 %v2031_v17 }
 0x624   : > { %1758 = vmatpush3.bf16.msra.mxu0 %v1865_v2 }
 0x6c7   : > { %v1233_v35 = vpop.f32.mrf.mxu0 }
 0x6c8   : > { %v1234_v36 = vadd.f32 %v1603_v34, %v1233_v35 }
 0x6c9   : > { %v1733_v37 = vpop.f32.mrf.mxu0 }
 0x6ca   : > { %v2343_v38 = vadd.f32 %v1234_v36, %v2226_v1  ;;  %v1857_v1 = vld [vmem:[%s2457_s10] sm:$0xff]  }
 0x6cb   : > { %v1236_v39 = vpop.f32.mrf.mxu0  ;;  %1738 = vmatpush3.bf16.msra.mxu1 %v1857_v1 }
 0x6cc   : > { %v1242_v40 = vsel %vm537_vm0, %v2343_v38, 0.0 }
 0x6cd   : > { %1243 = vadd.xlane.f32.xlu0 %v1242_v40  ;;  %v1734_v41 = vpop.f32.mrf.mxu0 }
 0x756   : > { %v1244_v43 = vpop.xlane.xlu0 %1243 }
 0x757   : > { %v1245_v44 = vmul.f32 0.03125, %v1244_v43 }
 0x759   : > { %v1246_v45 = vsub.f32 %v2343_v38, %v1245_v44 }
 0x75b   : > { %v1247_v46 = vmul.f32 %v1246_v45, %v1246_v45 }
 0x75d   : > { %v1248_v47 = vsel %vm537_vm0, %v1247_v46, 0.0 }
 0x75e   : > { %1249 = vadd.xlane.f32.xlu1 %v1248_v47 }
 0x7e7   : > { %v1250_v51 = vpop.xlane.xlu1 %1249 }
 0x7e8   : > { %v1251_v52 = vmul.f32 0.03125, %v1250_v51 }
 0x7ea   : > { %v1252_v53 = vadd.f32 1e-05, %v1251_v52 }
 0x7ec   : > { %1886 = vrsqrt.f32 %v1252_v53 }
 0x7f9   : > { %v1887_v54 = vpop.eup %1886 }
 0x7fa   : > { %v1254_v56 = vmul.f32 %v1887_v54, %v1246_v45 }
 0x7fc   : > { %v1261_v58 = vmul.f32 %v1607_v55, %v1254_v56 }
 0x7fe   : > { %v1268_v59 = vadd.f32 %v1608_v57, %v1261_v58 }
 0x800   : > { %v1269_v60 = vpack.c.bf16 %v1268_v59, %v1268_v59 }
 0x802   : > { %1740 = vmatmul.mubr.msk.bf16.vlgmr.msra.gmra.mxu1 %vm537_vm0, %v1269_v60 }
 0x8c2   : > { %v1330_v4 = vpop.f32.mrf.mxu1 }
 0x8c3   : > { %v1331_v5 = vadd.f32 %v1609_v3, %v1330_v4 }
 0x8c4   : > { %v1741_v6 = vpop.f32.mrf.mxu1 }
 0x8c5   : > { %v1337_v7 = vmul.f32 0.70710677, %v1331_v5  ;;  %v1336_v11 = vmul.f32 0.5, %v1331_v5 }
 0x8c6   : > { %v1333_v8 = vpop.f32.mrf.mxu1 }
 0x8c7   : > { %1888 = verf.f32 %v1337_v7 }
 0x8c8   : > { %v1742_v9 = vpop.f32.mrf.mxu1 }
 0x8d4   : > { %v1889_v10 = vpop.eup %1888 }
 0x8d5   : > { %v1339_v12 = vadd.f32 1.0, %v1889_v10 }
 0x8d7   : > { %v1340_v13 = vmul.f32 %v1339_v12, %v1336_v11 }
 0x8d9   : > { %v1341_v17 = vpack.c.bf16 %v1340_v13, %v1340_v13 }
 0x8db   : > { %1760 = vmatmul.mubr.bf16.vlgmr.msra.gmra.mxu0 %v1341_v17 }
 0x99b   : > { %v1440_v14 = vpop.f32.mrf.mxu0 }
 0x99c   : > { %v1446_v16 = vadd.f32 %v1440_v14, %v2343_v38 }
 0x99d   : > { %v1761_v18 = vpop.f32.mrf.mxu0 }
 0x99e   : > { %v1454_v19 = vadd.f32 %v1621_v15, %v1446_v16 }
 0x99f   : > { %v1443_v20 = vpop.f32.mrf.mxu0 }
 0x9a0   : > { %1455 = vst.msk [vmem:[%s519_s22] sm:$0xff] %vm537_vm0, %v1454_v19 }
 0x9a1   : > { %v1762_v21 = vpop.f32.mrf.mxu0 }
 0x9a2   : > { %1955 = shalt.err (!%p1952_p9)
}
 0x9a3   : > { %s1956_s24 = scalar_lea.hbm %s2400_s15, 128  ;;  %s1960_s28 = scalar_lea.hbm %s2461_s14, 256 }
 0x9a4   : > { %p1957_p12 = scmp.ne.s32.totalorder %s2400_s15, %s1956_s24  ;;  %p1961_p5 = scmp.lt.s32.totalorder %s2400_s15, %s2461_s14 }
 0x9a5   : > { %p1962_p3 = scmp.lt.s32.totalorder %s1960_s28, %s1956_s24 }
 0x9a6   : > { %p1958_p1 = pnand %p1957_p12, %p2480_p10 }
 0x9a7   : > { %p1963_p4 = por %p1962_p3, %p1961_p5 }
 0x9a8   : > { %p1959_p2 = pneg %p1958_p1 }
 0x9aa   : > { %p1964_p8 = pnand %p1963_p4, %p1959_p2 }
 0x9ac   : > { %1967 = shalt.err (!%p1964_p8)
}
 0x9ad   : > { %1771 = dma.vmem_to_hbm [thread:$0]  (%p2480_p10), %s2402_s21, 128, %s2400_s15, %s1457_s16  }
 0x9ae PF: > { %s2481_s20 = sld [smem:[#allocation15_spill]]  ;;  %p1788_p11 = scmp.ge.s32.totalorder %s2026_s18, 2 }
 0x9af   : > { %s1483_s26 = sand.u32 1, %s2006_s29  }
 0x9b0   : > { %s1484_s27 = scalar_lea.sflag [#allocation5], %s1483_s26 }
 0x9b4   : > { %p2482_p13 = scmp.ne.s32.totalorder %s2481_s20, 0 }
 0x9b6   : > { %p1781_p0 = pnand %p1788_p11, %p2482_p13 }
 0x9b8   : > { %p1782_p6 = pneg %p1781_p0 }
 0x9ba   : > { %2001 = dma.done.wait (%p1782_p6), %s1484_s27, 128  }
 0x9bb   : > { %2003 = vsyncadd (%p1782_p6), %s1484_s27, 4294967168  ;;  %s29_s18 = sadd.s32 1, %s2026_s18   ;;  %s2483_s23 = sld [smem:[#allocation12_spill]] }
 0x9bc   : > { %p26_p7 = scmp.ge.s32.totalorder %s29_s18, 4   ;;  %s2484_s15 = sld [smem:[#allocation16_spill]] }
 0x9bd   : > { %s2485_s16 = sld [smem:[#allocation13_spill]]  ;;  %s2487_s29 = smov %s2010_s30 }
 0x9be   : > { %s2486_s17 = sld [smem:[#allocation14_spill]]  ;;  %28 = sbr.rel (!%p26_p7) target bundleno = 6 (0x6), region = 123 }
 0x9c1   : > { %s2488_s30 = smov %s2483_s23 }
 0x9c3   :  { %1489 = vsyncpa [#allocation4], 1 }
 0x9c4   :  { %1491 = vsyncpa [#allocation4 + $0x1], 1 }
 0x9c5   :  { %1492 = vsyncpa [#allocation7], 1 }
 0x9c6   :  { %1493 = vsyncpa [#allocation5], 1 }
 0x9c7   :  { %1495 = vsyncpa [#allocation5 + $0x1], 1 }

</bundles_post_ra>
